<compile_context>
chip_gen: v7x
topology: tpu7x:2x2x1
jax: 0.10.0
libtpu: 0.0.40
codegen_flags: <defaults>
</compile_context>

<pallas_src>
import jax
import jax.numpy as jnp
from jax.experimental import pallas as pl
from jax.experimental.pallas import tpu as pltpu


def mlp_kernel(x_ref, w1_ref, w23_ref, b123_ref, w4_ref, b4_ref, o_ref):
    """Full 4-layer MLP + softmax on one (TB, in_dim) batch tile.

    Weights/biases are grid-resident; x / out are tiled over the batch grid
    axis.  Matmuls accumulate in f32; elementwise math stays in f32; matmul
    inputs may be bf16 (dtype of the packed weights).
    """
    mm_dtype = w1_ref.dtype  # f32 or bf16, matches packed weights

    x = x_ref[...]

    # layer1 + ReLU
    h = jnp.dot(x, w1_ref[...], preferred_element_type=jnp.float32)
    h = jnp.maximum(h + b123_ref[0:1, :], 0.0)

    # layer2 + ReLU
    h = jnp.dot(h.astype(mm_dtype), w23_ref[0], preferred_element_type=jnp.float32)
    h = jnp.maximum(h + b123_ref[1:2, :], 0.0)

    # layer3 + ReLU
    h = jnp.dot(h.astype(mm_dtype), w23_ref[1], preferred_element_type=jnp.float32)
    h = jnp.maximum(h + b123_ref[2:3, :], 0.0)

    # layer4 (lane-dense, 128-wide; padding lanes carry bias = -1e30)
    logits = jnp.dot(h.astype(mm_dtype), w4_ref[...],
                     preferred_element_type=jnp.float32) + b4_ref[...]

    # stable softmax over the feature axis (PyTorch dim=1); padded lanes -> 0
    m = jnp.max(logits, axis=-1, keepdims=True)
    e = jnp.exp(logits - m)
    denom = jnp.sum(e, axis=-1, keepdims=True)
    o_ref[...] = (e * pl.reciprocal(denom, approx=True)).astype(o_ref.dtype)


def mlp_forward(x, params, *, use_bf16=False, batch_tile=512):
    """Run the 4-layer MLP + softmax in one Pallas kernel, tiled over batch."""
    (w1, b1), (w2, b2), (w3, b3), (w4, b4) = params
    batch, in_dim = x.shape
    hid = w1.shape[1]        # 40
    out_dim = w4.shape[1]    # 10
    out_pad = 128            # lane-dense output width

    # --- pack small operands (9 inputs -> 6) ------------------------------
    w23 = jnp.stack([w2, w3], axis=0)                                    # (2,40,40)
    b123 = jnp.stack([b1.reshape(-1), b2.reshape(-1), b3.reshape(-1)])   # (3,40)
    w4p = jnp.zeros((hid, out_pad), jnp.float32).at[:, :out_dim].set(w4)
    # padding lanes get a huge negative bias -> exp underflows to exactly 0
    b4p = jnp.full((1, out_pad), -1e30, jnp.float32).at[0, :out_dim].set(b4.reshape(-1))

    if use_bf16:
        # bf16 MXU inputs; accumulation and all elementwise math stay f32.
        x_in = x.astype(jnp.bfloat16)
        w1_in = w1.astype(jnp.bfloat16)
        w23_in = w23.astype(jnp.bfloat16)
        w4p_in = w4p.astype(jnp.bfloat16)
    else:
        x_in, w1_in, w23_in, w4p_in = x, w1, w23, w4p

    # --- batch tiling: TB in [8, batch_tile], batch padded to a multiple ---
    tb = batch_tile if batch >= batch_tile else max(8, ((batch + 7) // 8) * 8)
    batch_pad = ((batch + tb - 1) // tb) * tb
    if batch_pad != batch:
        x_in = jnp.pad(x_in, ((0, batch_pad - batch), (0, 0)))
    grid = (batch_pad // tb,)

    flops = 2 * batch_pad * (in_dim * hid + 2 * hid * hid + hid * out_pad)
    bytes_accessed = int(
        x_in.size * x_in.dtype.itemsize
        + w1_in.size * w1_in.dtype.itemsize
        + w23_in.size * w23_in.dtype.itemsize
        + w4p_in.size * w4p_in.dtype.itemsize
        + b123.size * 4 + b4p.size * 4
        + batch_pad * out_pad * 4)

    out = pl.pallas_call(
        mlp_kernel,
        out_shape=jax.ShapeDtypeStruct((batch_pad, out_pad), jnp.float32),
        grid=grid,
        in_specs=[
            pl.BlockSpec((tb, in_dim), lambda i: (i, 0)),        # x: tiled over batch
            pl.BlockSpec((in_dim, hid), lambda i: (0, 0)),       # w1: resident
            pl.BlockSpec((2, hid, hid), lambda i: (0, 0, 0)),    # w2,w3 stacked: resident
            pl.BlockSpec((3, hid), lambda i: (0, 0)),            # b1..b3 stacked: resident
            pl.BlockSpec((hid, out_pad), lambda i: (0, 0)),      # w4 (lane-padded): resident
            pl.BlockSpec((1, out_pad), lambda i: (0, 0)),        # b4 (lane-padded): resident
        ],
        out_specs=pl.BlockSpec((tb, out_pad), lambda i: (i, 0)),  # lane-dense output
        compiler_params=pltpu.CompilerParams(
            dimension_semantics=("parallel",),   # shard batch axis across TCs (v7x)
            vmem_limit_bytes=32 * 1024 * 1024,
        ),
        cost_estimate=pl.CostEstimate(
            flops=flops,
            transcendentals=batch_pad * out_pad,
            bytes_accessed=bytes_accessed,
        ),
    )(x_in, w1_in, w23_in, b123, w4p_in, b4p)

    return out[:batch, :out_dim]


mlp_forward_jit = jax.jit(mlp_forward, static_argnames=("use_bf16", "batch_tile"))


def init_params(key, input_dim):
    """Deterministic init mimicking torch.nn.Linear default (uniform +/- 1/sqrt(fan_in))."""
    dims = [(input_dim, 40), (40, 40), (40, 40), (40, 10)]
    params = []
    for fan_in, fan_out in dims:
        key, kw, kb = jax.random.split(key, 3)
        bound = 1.0 / jnp.sqrt(fan_in)
        w = jax.random.uniform(kw, (fan_in, fan_out), jnp.float32, -bound, bound)
        b = jax.random.uniform(kb, (fan_out,), jnp.float32, -bound, bound)
        params.append((w, b))
    return params


def reference_forward(x, params):
    h = x
    for i, (w, b) in enumerate(params):
        h = h @ w + b
        if i < 3:
            h = jnp.maximum(h, 0.0)
    return jax.nn.softmax(h, axis=1)


if __name__ == "__main__":
    key = jax.random.PRNGKey(0)
    kx, kp = jax.random.split(key)

    batch_size = 8
    input_dim = 32
    x = jax.random.normal(kx, (batch_size, input_dim), jnp.float32)
    params = init_params(kp, input_dim)

    ref = reference_forward(x, params)

    # f32 matmul path
    out = jax.block_until_ready(mlp_forward_jit(x, params))
    assert out.shape == (batch_size, 10)
    # tolerance loosened slightly for the approx-reciprocal softmax epilogue
    assert jnp.allclose(out, ref, atol=2e-2, rtol=2e-2)
    assert jnp.allclose(jnp.sum(out, axis=1), jnp.ones((batch_size,)), atol=2e-2)

    # bf16 MXU-input path (v5e/v6e/v7x friendly); f32 accumulation/elementwise
    out_bf16 = jax.block_until_ready(mlp_forward_jit(x, params, use_bf16=True))
    assert out_bf16.shape == (batch_size, 10)
    assert jnp.allclose(out_bf16, ref, atol=5e-2, rtol=5e-2)

    print("KERNEL_OK")
</pallas_src>

<mosaic_0001>
module attributes {stable_mosaic.version = 11 : i64} {
  func.func @mlp_kernel(%arg0: i32, %arg1: memref<8x32xf32, #tpu.memory_space<vmem>>, %arg2: memref<32x40xf32, #tpu.memory_space<vmem>>, %arg3: memref<2x40x40xf32, #tpu.memory_space<vmem>>, %arg4: memref<3x40xf32, #tpu.memory_space<vmem>>, %arg5: memref<40x128xf32, #tpu.memory_space<vmem>>, %arg6: memref<1x128xf32, #tpu.memory_space<vmem>>, %arg7: memref<8x128xf32, #tpu.memory_space<vmem>>) attributes {dimension_semantics = [#tpu.dimension_semantics<parallel>], iteration_bounds = array<i64: 1>, scalar_prefetch = 0 : i64, scratch_operands = 0 : i64, tpu.core_type = #tpu.core_type<tc>, window_params = [{transform_indices = @transform_0, window_bounds = array<i64: 8, 32>}, {pipeline_mode = #tpu.pipeline_mode<synchronous>, transform_indices = @transform_1, window_bounds = array<i64: 32, 40>}, {pipeline_mode = #tpu.pipeline_mode<synchronous>, transform_indices = @transform_2, window_bounds = array<i64: 2, 40, 40>}, {pipeline_mode = #tpu.pipeline_mode<synchronous>, transform_indices = @transform_3, window_bounds = array<i64: 3, 40>}, {pipeline_mode = #tpu.pipeline_mode<synchronous>, transform_indices = @transform_4, window_bounds = array<i64: 40, 128>}, {pipeline_mode = #tpu.pipeline_mode<synchronous>, transform_indices = @transform_5, window_bounds = array<i64: 1, 128>}, {transform_indices = @transform_6, window_bounds = array<i64: 8, 128>}]} {
    %c0 = arith.constant 0 : index
    %c0_0 = arith.constant 0 : index
    %0 = vector.load %arg1[%c0, %c0_0] : memref<8x32xf32, #tpu.memory_space<vmem>>, vector<8x32xf32>
    %c0_1 = arith.constant 0 : index
    %c0_2 = arith.constant 0 : index
    %1 = vector.load %arg2[%c0_1, %c0_2] : memref<32x40xf32, #tpu.memory_space<vmem>>, vector<32x40xf32>
    %cst = arith.constant dense<0.000000e+00> : vector<8x40xf32>
    %2 = tpu.matmul %0, %1, %cst {dimension_numbers = #tpu.dot_dimension_numbers<[1], [0], [0], [1], [0, 0, 1, 1], [], []>} : vector<8x32xf32>, vector<32x40xf32>, vector<8x40xf32> -> vector<8x40xf32>
    %c0_3 = arith.constant 0 : index
    %c0_4 = arith.constant 0 : index
    %3 = vector.load %arg4[%c0_3, %c0_4] : memref<3x40xf32, #tpu.memory_space<vmem>>, vector<1x40xf32>
    %4 = vector.broadcast %3 : vector<1x40xf32> to vector<8x40xf32>
    %5 = arith.addf %2, %4 : vector<8x40xf32>
    %cst_5 = arith.constant 0.000000e+00 : f32
    %6 = vector.broadcast %cst_5 : f32 to vector<8x40xf32>
    %7 = arith.maximumf %5, %6 : vector<8x40xf32>
    %c0_6 = arith.constant 0 : index
    %c0_7 = arith.constant 0 : index
    %c0_8 = arith.constant 0 : index
    %8 = vector.load %arg3[%c0_6, %c0_7, %c0_8] : memref<2x40x40xf32, #tpu.memory_space<vmem>>, vector<1x40x40xf32>
    %9 = vector.shape_cast %8 : vector<1x40x40xf32> to vector<40x40xf32>
    %cst_9 = arith.constant dense<0.000000e+00> : vector<8x40xf32>
    %10 = tpu.matmul %7, %9, %cst_9 {dimension_numbers = #tpu.dot_dimension_numbers<[1], [0], [0], [1], [0, 0, 1, 1], [], []>} : vector<8x40xf32>, vector<40x40xf32>, vector<8x40xf32> -> vector<8x40xf32>
    %c1 = arith.constant 1 : index
    %c0_10 = arith.constant 0 : index
    %11 = vector.load %arg4[%c1, %c0_10] : memref<3x40xf32, #tpu.memory_space<vmem>>, vector<1x40xf32>
    %12 = vector.broadcast %11 : vector<1x40xf32> to vector<8x40xf32>
    %13 = arith.addf %10, %12 : vector<8x40xf32>
    %cst_11 = arith.constant 0.000000e+00 : f32
    %14 = vector.broadcast %cst_11 : f32 to vector<8x40xf32>
    %15 = arith.maximumf %13, %14 : vector<8x40xf32>
    %c1_12 = arith.constant 1 : index
    %c0_13 = arith.constant 0 : index
    %c0_14 = arith.constant 0 : index
    %16 = vector.load %arg3[%c1_12, %c0_13, %c0_14] : memref<2x40x40xf32, #tpu.memory_space<vmem>>, vector<1x40x40xf32>
    %17 = vector.shape_cast %16 : vector<1x40x40xf32> to vector<40x40xf32>
    %cst_15 = arith.constant dense<0.000000e+00> : vector<8x40xf32>
    %18 = tpu.matmul %15, %17, %cst_15 {dimension_numbers = #tpu.dot_dimension_numbers<[1], [0], [0], [1], [0, 0, 1, 1], [], []>} : vector<8x40xf32>, vector<40x40xf32>, vector<8x40xf32> -> vector<8x40xf32>
    %c2 = arith.constant 2 : index
    %c0_16 = arith.constant 0 : index
    %19 = vector.load %arg4[%c2, %c0_16] : memref<3x40xf32, #tpu.memory_space<vmem>>, vector<1x40xf32>
    %20 = vector.broadcast %19 : vector<1x40xf32> to vector<8x40xf32>
    %21 = arith.addf %18, %20 : vector<8x40xf32>
    %cst_17 = arith.constant 0.000000e+00 : f32
    %22 = vector.broadcast %cst_17 : f32 to vector<8x40xf32>
    %23 = arith.maximumf %21, %22 : vector<8x40xf32>
    %c0_18 = arith.constant 0 : index
    %c0_19 = arith.constant 0 : index
    %24 = vector.load %arg5[%c0_18, %c0_19] : memref<40x128xf32, #tpu.memory_space<vmem>>, vector<40x128xf32>
    %cst_20 = arith.constant dense<0.000000e+00> : vector<8x128xf32>
    %25 = tpu.matmul %23, %24, %cst_20 {dimension_numbers = #tpu.dot_dimension_numbers<[1], [0], [0], [1], [0, 0, 1, 1], [], []>} : vector<8x40xf32>, vector<40x128xf32>, vector<8x128xf32> -> vector<8x128xf32>
    %c0_21 = arith.constant 0 : index
    %c0_22 = arith.constant 0 : index
    %26 = vector.load %arg6[%c0_21, %c0_22] : memref<1x128xf32, #tpu.memory_space<vmem>>, vector<1x128xf32>
    %27 = vector.broadcast %26 : vector<1x128xf32> to vector<8x128xf32>
    %28 = arith.addf %25, %27 : vector<8x128xf32>
    %cst_23 = arith.constant dense<0xFF800000> : vector<8xf32>
    %29 = vector.multi_reduction <maximumf>, %28, %cst_23 [1] : vector<8x128xf32> to vector<8xf32>
    %30 = vector.shape_cast %29 : vector<8xf32> to vector<8x1xf32>
    %31 = vector.broadcast %30 : vector<8x1xf32> to vector<8x128xf32>
    %32 = arith.subf %28, %31 : vector<8x128xf32>
    %33 = math.exp %32 : vector<8x128xf32>
    %cst_24 = arith.constant dense<0.000000e+00> : vector<8xf32>
    %34 = vector.multi_reduction <add>, %33, %cst_24 [1] : vector<8x128xf32> to vector<8xf32>
    %35 = vector.shape_cast %34 : vector<8xf32> to vector<8x1xf32>
    %36 = tpu.reciprocal %35 {approx = true} : vector<8x1xf32> -> vector<8x1xf32>
    %37 = vector.broadcast %36 : vector<8x1xf32> to vector<8x128xf32>
    %38 = arith.mulf %33, %37 : vector<8x128xf32>
    %c0_25 = arith.constant 0 : index
    %c0_26 = arith.constant 0 : index
    %39 = vector.load %arg7[%c0_25, %c0_26] : memref<8x128xf32, #tpu.memory_space<vmem>>, vector<8x128xf32>
    tpu.vector_store %arg7[%c0_25, %c0_26], %38 {strides = array<i32>} : memref<8x128xf32, #tpu.memory_space<vmem>>, vector<8x128xf32>,
    return
  }
  func.func @transform_0(%arg0: i32) -> (i32, i32) {
    %c0_i32 = arith.constant 0 : i32
    %c0_i32_0 = arith.constant 0 : i32
    return %arg0, %c0_i32 : i32, i32
  }
  func.func @transform_1(%arg0: i32) -> (i32, i32) {
    %c0_i32 = arith.constant 0 : i32
    %c0_i32_0 = arith.constant 0 : i32
    %c0_i32_1 = arith.constant 0 : i32
    return %c0_i32, %c0_i32_0 : i32, i32
  }
  func.func @transform_2(%arg0: i32) -> (i32, i32, i32) {
    %c0_i32 = arith.constant 0 : i32
    %c0_i32_0 = arith.constant 0 : i32
    %c0_i32_1 = arith.constant 0 : i32
    %c0_i32_2 = arith.constant 0 : i32
    return %c0_i32, %c0_i32_0, %c0_i32_1 : i32, i32, i32
  }
  func.func @transform_3(%arg0: i32) -> (i32, i32) {
    %c0_i32 = arith.constant 0 : i32
    %c0_i32_0 = arith.constant 0 : i32
    %c0_i32_1 = arith.constant 0 : i32
    return %c0_i32, %c0_i32_0 : i32, i32
  }
  func.func @transform_4(%arg0: i32) -> (i32, i32) {
    %c0_i32 = arith.constant 0 : i32
    %c0_i32_0 = arith.constant 0 : i32
    %c0_i32_1 = arith.constant 0 : i32
    return %c0_i32, %c0_i32_0 : i32, i32
  }
  func.func @transform_5(%arg0: i32) -> (i32, i32) {
    %c0_i32 = arith.constant 0 : i32
    %c0_i32_0 = arith.constant 0 : i32
    %c0_i32_1 = arith.constant 0 : i32
    return %c0_i32, %c0_i32_0 : i32, i32
  }
  func.func @transform_6(%arg0: i32) -> (i32, i32) {
    %c0_i32 = arith.constant 0 : i32
    %c0_i32_0 = arith.constant 0 : i32
    return %arg0, %c0_i32 : i32, i32
  }
}

</mosaic_0001>

<bundles_post_ra>
// kernel: mlp_forward.1
= control target key start
LH: loop header
LB: loop body
LE: loop exit
PB: predicated region body
PF: predicated region fallthrough
CT: control target
= control target key end

     0   :  { %v530_v3 = vmov 0.0|0.0   ;;  %vm531_vm0 = vmmov 0   ;;  %v532_v6 = vmov 0.0   ;;  %s660_s0 = inlined_call_operand.vmem [shape: f32[8,32], index: 0, kind: input, shape index: {}]   ;;  %s661_s1 = inlined_call_operand.vmem [shape: f32[32,40], index: 1, kind: input, shape index: {}]   ;;  %s662_s2 = inlined_call_operand.vmem [shape: f32[2,40,40], index: 2, kind: input, shape index: {}]   ;;  %s663_s3 = inlined_call_operand.vmem [shape: f32[3,40], index: 3, kind: input, shape index: {}]   ;;  %s664_s4 = inlined_call_operand.vmem [shape: f32[40,128], index: 4, kind: input, shape index: {}]   ;;  %s665_s5 = inlined_call_operand.vmem [shape: f32[1,128], index: 5, kind: input, shape index: {}]   ;;  %s666_s6 = inlined_call_operand.hbm [shape: f32[8,128], index: 6, kind: output, shape index: {}]  }
   0x1   :  { %v25_v0 = vld [vmem:[%s661_s1] sm:$0xff]  ;;  %v26_v1 = vld [vmem:[%s661_s1 + $0x8] sm:$0xff]  ;;  %v27_v2 = vld [vmem:[%s661_s1 + $0x10] sm:$0xff]  ;;  %474 = vmatprep.subr.bf16.mxu0 %v530_v3  ;;  %432 = vmatprep.mubr.msk.f32.mxu0 %vm531_vm0, %v532_v6 }
   0x2   :  { %v475_v4 = vpack.c.bf16 %v26_v1, %v25_v0  ;;  %v28_v5 = vld [vmem:[%s661_s1 + $0x18] sm:$0xff]  ;;  %v109_v7 = vld [vmem:[%s662_s2] sm:$0xff]  ;;  %480 = vmatprep.subr.bf16.mxu1 %v530_v3  ;;  %v110_v8 = vld [vmem:[%s662_s2 + $0x8] sm:$0xff]  ;;  %445 = vmatprep.mubr.msk.f32.mxu1 %vm531_vm0, %v532_v6 }
   0x3   :  { %11 = vsyncpa [#allocation3], 0  ;;  %v478_v9 = vpack.c.bf16 %v28_v5, %v27_v2  ;;  %v481_v10 = vpack.c.bf16 %v110_v8, %v109_v7  ;;  %v24_v11 = vld [vmem:[%s660_s0] sm:$0xff]  ;;  %vm34_vm1 = vcmask 261120   ;;  %v111_v12 = vld [vmem:[%s662_s2 + $0x10] sm:$0xff]  ;;  %vm119_vm2 = vcmask 326656  }
   0x4   :  { %476 = vmatpush3.bf16.msra.mxu0 %v475_v4  ;;  %v112_v13 = vld [vmem:[%s662_s2 + $0x18] sm:$0xff]  ;;  %v113_v15 = vld [vmem:[%s662_s2 + $0x20] sm:$0xff]  ;;  %v392_v16 = vld [vmem:[%s662_s2 + $0x28] sm:$0xff] }
   0x5   :  { %477 = vmatprep.subr.bf16.mxu0 %v530_v3  ;;  %482 = vmatpush3.bf16.msra.mxu1 %v481_v10  ;;  %v484_v14 = vpack.c.bf16 %v112_v13, %v111_v12  ;;  %v393_v17 = vld [vmem:[%s662_s2 + $0x30] sm:$0xff]  ;;  %v388_v19 = vld [vmem:[%s663_s3] ss:$0 sm:$0xff]  ;;  %v394_v24 = vld [vmem:[%s662_s2 + $0x38] sm:$0xff] }
   0x6   :  { %483 = vmatprep.subr.bf16.mxu1 %v530_v3  ;;  %v487_v18 = vpack.c.bf16 %v393_v17, %v392_v16  ;;  %v395_v25 = vld [vmem:[%s662_s2 + $0x40] sm:$0xff]  ;;  %v396_v27 = vld [vmem:[%s662_s2 + $0x48] sm:$0xff]  ;;  %v281_v36 = vld [vmem:[%s664_s4 + $0x10] sm:$0xff] }
   0x7   :  { %v490_v26 = vpack.c.bf16 %v395_v25, %v394_v24  ;;  %v279_v28 = vld [vmem:[%s664_s4] sm:$0xff]  ;;  %v280_v29 = vld [vmem:[%s664_s4 + $0x8] sm:$0xff]  ;;  %v282_v37 = vld [vmem:[%s664_s4 + $0x18] sm:$0xff] }
   0x8   :  { %479 = vmatpush3.bf16.msra.mxu0 %v478_v9  ;;  %v493_v30 = vpack.c.bf16 %v280_v29, %v279_v28  ;;  %v390_v31 = vld [vmem:[%s663_s3 + $0x1] ss:$0 sm:$0xff]  ;;  %v496_v38 = vpack.c.bf16 %v282_v37, %v281_v36  ;;  %v397_v40 = vld [vmem:[%s663_s3 + $0x2] ss:$0 sm:$0xff]  ;;  %v399_v45 = vld [vmem:[%s665_s5] ss:$0 sm:$0xff] }
   0x9   :  { %486 = vmatprep.subr.bf16.mxu0 %v530_v3  ;;  %485 = vmatpush3.bf16.msra.mxu1 %v484_v14  ;;  %v283_v39 = vld [vmem:[%s664_s4 + $0x20] sm:$0xff]  ;;  %s533_s3 = smov [#allocation2]  }
   0xa   :  { %443 = vmatprep.subr.mxu1 %v532_v6  ;;  %s380_s4 = sshll.u32 %s533_s3, 4  ;;  %s381_s4 = int_to_ptr.vmem [resolvable:$true] %s380_s4 }
   0xb   :  { %433 = vmatmul.mubr.msk.f32.vlgmr.msra.gmra.mrb[0].mxu0 %vm34_vm1, %v24_v11  ;;  %s506_s16 = scalar_lea.vmem %s381_s4, 128  ;;  %p511_p1 = scmp.lt.s32.totalorder %s381_s4, %s381_s4 }
   0xc   :  { %458 = vmatprep.mubr.msk.f32.mxu0 %vm531_vm0, %v532_v6  ;;  %488 = vmatpush3.bf16.msra.mxu0 %v487_v18  ;;  %p507_p0 = scmp.ne.s32.totalorder %s381_s4, %s506_s16  ;;  %p512_p2 = scmp.lt.s32.totalorder %s506_s16, %s506_s16 }
   0xd   :  { %444 = vmatpush3.msra.mxu1 %v113_v15  ;;  %489 = vmatprep.subr.bf16.mxu0 %v530_v3 }
   0xe   :  { %492 = vmatprep.subr.bf16.mxu1 %v530_v3  ;;  %p513_p3 = por %p512_p2, %p511_p1 }
  0x10   :  { %491 = vmatpush3.bf16.msra.mxu0 %v490_v26  ;;  %p514_p4 = pnand %p513_p3, %p507_p0 }
  0x11   :  { %456 = vmatprep.subr.mxu0 %v532_v6 }
  0x14   :  { %457 = vmatpush3.msra.mxu0 %v396_v27 }
  0xde   :  { %v104_v20 = vpop.f32.mrb[0].mxu0 }
  0xdf   :  { %v105_v21 = vadd.f32 %v388_v19, %v104_v20  ;;  %v434_v22 = vpop.f32.mrb[1].mxu0 }
  0xe1   :  { %v108_v23 = vmax.f32 %v105_v21, 0.0 }
  0xe3   :  { %446 = vmatmul.mubr.msk.f32.vlgmr.msra.gmra.mrb[0].mxu1 %vm119_vm2, %v108_v23 }
  0xe4   :  { %471 = vmatprep.mubr.msk.f32.mxu1 %vm531_vm0, %v532_v6  ;;  %494 = vmatpush3.bf16.msra.mxu1 %v493_v30 }
  0xe5   :  { %495 = vmatprep.subr.bf16.mxu1 %v530_v3 }
  0xe8   :  { %497 = vmatpush3.bf16.msra.mxu1 %v496_v38 }
  0xe9   :  { %469 = vmatprep.subr.mxu1 %v532_v6 }
  0xec   :  { %470 = vmatpush3.msra.mxu1 %v283_v39 }
 0x1b6   :  { %v189_v32 = vpop.f32.mrb[0].mxu1 }
 0x1b7   :  { %v190_v33 = vadd.f32 %v390_v31, %v189_v32  ;;  %v447_v34 = vpop.f32.mrb[1].mxu1 }
 0x1b9   :  { %v193_v35 = vmax.f32 %v190_v33, 0.0 }
 0x1bb   :  { %459 = vmatmul.mubr.msk.f32.vlgmr.msra.gmra.mrb[2].mxu0 %vm119_vm2, %v193_v35 }
 0x28e   :  { %v274_v41 = vpop.f32.mrb[2].mxu0 }
 0x28f   :  { %v275_v42 = vadd.f32 %v397_v40, %v274_v41  ;;  %v460_v43 = vpop.f32.mrb[3].mxu0 }
 0x291   :  { %v278_v44 = vmax.f32 %v275_v42, 0.0 }
 0x293   :  { %472 = vmatmul.mubr.msk.f32.vlgmr.msra.gmra.mrb[2].mxu1 %vm119_vm2, %v278_v44 }
 0x366   :  { %v360_v46 = vpop.f32.mrb[2].mxu1 }
 0x367   :  { %v361_v47 = vadd.f32 %v399_v45, %v360_v46  ;;  %v473_v48 = vpop.f32.mrb[3].mxu1 }
 0x369   :  { %364 = vmax.xlane.f32.xlu0 %v361_v47 }
 0x3f6   :  { %v365_v49 = vpop.xlane.xlu0 %364 }
 0x3f7   :  { %v366_v50 = vsub.f32 %v361_v47, %v365_v49 }
 0x3f9   :  { %v367_v51 = vmul.f32 1.442695, %v366_v50 }
 0x3fb   :  { %502 = vpow2.f32 %v367_v51 }
 0x405   :  { %v503_v52 = vpop.eup %502 }
 0x406   :  { %369 = vadd.xlane.f32.xlu0 %v503_v52 }
 0x493   :  { %v370_v53 = vpop.xlane.xlu0 %369 }
 0x494   :  { %504 = vrcp.f32 %v370_v53 }
 0x49e   :  { %v505_v54 = vpop.eup %504 }
 0x49f   :  { %v372_v55 = vmul.f32 %v505_v54, %v503_v52 }
 0x4a1   :  { %373 = vst [vmem:[#allocation2] sm:$0xff] %v372_v55 }
 0x4a2   :  { %517 = shalt.err (!%p514_p4)
}
 0x4a3   :  { %s518_s18 = scalar_lea.hbm %s666_s6, 128 }
 0x4a4   :  { %p519_p5 = scmp.ne.s32.totalorder %s666_s6, %s518_s18  ;;  %p522_p6 = scmp.lt.u32.totalorder %s518_s18, %s666_s6 }
 0x4a6   :  { %p524_p7 = pnand %p522_p6, %p519_p5 }
 0x4a8   :  { %527 = shalt.err (!%p524_p7)
}
 0x4a9   :  { %383 = dma.vmem_to_hbm [thread:$0]  %s381_s4, 128, %s666_s6, [#allocation3]  }
 0x4aa   :  { %528 = dma.done.wait [#allocation3], 128  }
 0x4ab   :  { %529 = vsyncadd [#allocation3], 4294967168 }
 0x4ac   :  { %387 = vsyncpa [#allocation3], 1 }

</bundles_post_ra>
